<compile_context>
chip_gen: v7x
topology: tpu7x:2x2x1
jax: 0.10.0
libtpu: 0.0.40
codegen_flags: <defaults>
</compile_context>

<pallas_src>
import functools

import jax
import jax.numpy as jnp
from jax import lax
from jax.experimental import pallas as pl
from jax.experimental.pallas import tpu as pltpu

_SUB = 16  # sublane multiple safe for both f32 (8) and bf16 (16) packing


def _choose_tiles(B, D, itemsize):
    """Pick (tile_b, chunk_rows): big batch tile for DMA, bounded inner row chunk."""
    b_pad = ((B + _SUB - 1) // _SUB) * _SUB
    # 2 inputs x 2 pipeline buffers x tile_b x D x itemsize <= ~12 MiB input budget
    input_budget = 12 * 1024 * 1024
    tile = input_budget // (4 * D * itemsize)
    tile = max(_SUB, min(tile, 2048, b_pad))
    tile = (tile // _SUB) * _SUB
    # inner row chunk: keep ~4 f32 temporaries of (chunk, D) under ~8 MiB
    chunk = (8 * 1024 * 1024) // (16 * D)
    chunk = max(_SUB, min(tile, 256, (chunk // _SUB) * _SUB))
    while tile % chunk != 0:  # terminates: tile is a multiple of _SUB
        chunk -= _SUB
    return tile, chunk


def _make_mytryoshka_kernel(margin, total_batch, tile_b, chunk_rows):
    n_chunks = tile_b // chunk_rows

    def kernel(q_ref, t_ref, o_ref, acc_ref):
        i = pl.program_id(0)

        @pl.when(i == 0)
        def _():
            acc_ref[0] = jnp.float32(0.0)

        base_row = i * tile_b

        def chunk_body(c, partial):
            r0 = pl.multiple_of(c * chunk_rows, chunk_rows)
            # Load in native dtype, upcast in-register (VPU); reduce (XLU); sqrt (EUP).
            q = q_ref[pl.ds(r0, chunk_rows), :].astype(jnp.float32)
            t = t_ref[pl.ds(r0, chunk_rows), :].astype(jnp.float32)
            diff = q - t
            sq_sum = jnp.sum(diff * diff, axis=1, keepdims=True)        # (chunk, 1)
            dist = jnp.sqrt(sq_sum)
            hinge = jnp.maximum(jnp.float32(margin) - dist, 0.0)
            # Mask rows beyond the true batch (padding of the last grid tile).
            rows = base_row + r0 + lax.broadcasted_iota(
                jnp.int32, (chunk_rows, 1), 0)
            hinge = jnp.where(rows < total_batch, hinge, jnp.float32(0.0))
            return partial + jnp.sum(hinge)

        acc_ref[0] += lax.fori_loop(0, n_chunks, chunk_body, jnp.float32(0.0),
                                    unroll=True)

        @pl.when(i == pl.num_programs(0) - 1)
        def _():
            o_ref[0] = acc_ref[0] / jnp.float32(total_batch)

    return kernel


@functools.partial(jax.jit, static_argnames=("margin", "tile_b"))
def mytryoshka_loss(query_embeddings, target_embeddings, margin=1.0, tile_b=None):
    """Pallas TPU implementation of MytryoshkaLoss.forward."""
    B, D = query_embeddings.shape
    assert target_embeddings.shape == (B, D)

    itemsize = max(jnp.dtype(query_embeddings.dtype).itemsize,
                   jnp.dtype(target_embeddings.dtype).itemsize)
    if tile_b is None:
        tile_b, chunk_rows = _choose_tiles(B, D, itemsize)
    else:
        chunk_rows = max(_SUB, min(tile_b, 256))
        while tile_b % chunk_rows != 0:
            chunk_rows -= _SUB

    grid = (pl.cdiv(B, tile_b),)
    kernel = _make_mytryoshka_kernel(float(margin), B, tile_b, chunk_rows)

    # Bandwidth-bound: reads 2*B*D elements, ~3 flops/element, B sqrt's.
    cost = pl.CostEstimate(
        flops=3 * B * D + 2 * B,
        transcendentals=B,
        bytes_accessed=2 * B * D * itemsize + 4,
    )
    # Double-buffered inputs + f32 chunk temporaries fit well under 32 MiB with the
    # budgets above; 32 MiB is within every generation's physical VMEM (v7x: 64 MiB).
    vmem_limit = 32 * 1024 * 1024

    out = pl.pallas_call(
        kernel,
        out_shape=jax.ShapeDtypeStruct((1,), jnp.float32),
        grid_spec=pltpu.PrefetchScalarGridSpec(
            num_scalar_prefetch=0,
            grid=grid,
            in_specs=[
                pl.BlockSpec((tile_b, D), lambda i: (i, 0)),
                pl.BlockSpec((tile_b, D), lambda i: (i, 0)),
            ],
            out_specs=pl.BlockSpec(memory_space=pltpu.SMEM),
            scratch_shapes=[pltpu.SMEM((1,), jnp.float32)],
        ),
        compiler_params=pltpu.CompilerParams(
            dimension_semantics=("arbitrary",),  # sequential SMEM accumulation
            vmem_limit_bytes=vmem_limit,
        ),
        cost_estimate=cost,
    )(query_embeddings, target_embeddings)
    return out[0]


def mytryoshka_loss_ref(q, t, margin=1.0):
    dist = jnp.linalg.norm(q.astype(jnp.float32) - t.astype(jnp.float32), axis=1)
    return jnp.mean(jnp.maximum(margin - dist, 0.0))


if __name__ == "__main__":
    key = jax.random.PRNGKey(0)
    k1, k2, k3, k4 = jax.random.split(key, 4)

    # Case 1: small f32, B divisible by the tile.
    B, D = 16, 128
    # Scale so that some distances fall below the margin (hinge is active).
    query = jax.random.normal(k1, (B, D), dtype=jnp.float32) * 0.05
    target = jax.random.normal(k2, (B, D), dtype=jnp.float32) * 0.05

    loss = jax.block_until_ready(mytryoshka_loss(query, target, margin=1.0))
    ref = jax.block_until_ready(mytryoshka_loss_ref(query, target, margin=1.0))
    assert jnp.allclose(loss, ref, rtol=1e-5, atol=1e-5), (loss, ref)

    # Case 2: non-divisible batch (exercises cdiv grid + row masking), bf16 ingestion.
    B2, D2 = 50, 128
    q2 = (jax.random.normal(k3, (B2, D2), dtype=jnp.float32) * 0.05).astype(jnp.bfloat16)
    t2 = (jax.random.normal(k4, (B2, D2), dtype=jnp.float32) * 0.05).astype(jnp.bfloat16)

    loss2 = jax.block_until_ready(mytryoshka_loss(q2, t2, margin=1.0))
    ref2 = jax.block_until_ready(mytryoshka_loss_ref(q2, t2, margin=1.0))
    assert jnp.allclose(loss2, ref2, rtol=1e-2, atol=1e-2), (loss2, ref2)

    print("KERNEL_OK")
</pallas_src>

<mosaic_0001>
module attributes {stable_mosaic.version = 11 : i64} {
  func.func @kernel(%arg0: i32, %arg1: memref<16x128xf32, #tpu.memory_space<vmem>>, %arg2: memref<16x128xf32, #tpu.memory_space<vmem>>, %arg3: memref<1xf32, #tpu.memory_space<smem>>, %arg4: memref<1xf32, #tpu.memory_space<smem>>) attributes {dimension_semantics = [#tpu.dimension_semantics<arbitrary>], iteration_bounds = array<i64: 1>, scalar_prefetch = 0 : i64, scratch_operands = 1 : i64, tpu.core_type = #tpu.core_type<tc>, window_params = [{transform_indices = @transform_0, window_bounds = array<i64: 16, 128>}, {transform_indices = @transform_1, window_bounds = array<i64: 16, 128>}, {transform_indices = @transform_2, window_bounds = array<i64: 1>}]} {
    %c0_i32 = arith.constant 0 : i32
    %0 = arith.cmpi eq, %arg0, %c0_i32 : i32
    %1 = arith.extui %0 : i1 to i32
    %c0_i32_0 = arith.constant 0 : i32
    %2 = arith.cmpi ne, %1, %c0_i32_0 : i32
    scf.if %2 {
      %cst_14 = arith.constant 0.000000e+00 : f32
      %c0_15 = arith.constant 0 : index
      %38 = memref.load %arg4[%c0_15] : memref<1xf32, #tpu.memory_space<smem>>
      memref.store %cst_14, %arg4[%c0_15] : memref<1xf32, #tpu.memory_space<smem>>
    } else {
    }
    %c16_i32 = arith.constant 16 : i32
    %3 = arith.muli %arg0, %c16_i32 : i32
    %c0 = arith.constant 0 : index
    %4 = memref.load %arg4[%c0] : memref<1xf32, #tpu.memory_space<smem>>
    %cst = arith.constant 0.000000e+00 : f32
    %c0_i32_1 = arith.constant 0 : i32
    %c16_i32_2 = arith.constant 16 : i32
    %5 = arith.muli %c0_i32_1, %c16_i32_2 : i32
    %6 = tpu.assume_multiple %5, 16 : i32
    %7 = arith.index_cast %6 : i32 to index
    %c0_3 = arith.constant 0 : index
    %8 = vector.load %arg1[%7, %c0_3] : memref<16x128xf32, #tpu.memory_space<vmem>>, vector<16x128xf32>
    %9 = arith.index_cast %6 : i32 to index
    %c0_4 = arith.constant 0 : index
    %10 = vector.load %arg2[%9, %c0_4] : memref<16x128xf32, #tpu.memory_space<vmem>>, vector<16x128xf32>
    %11 = arith.subf %8, %10 : vector<16x128xf32>
    %12 = arith.mulf %11, %11 : vector<16x128xf32>
    %cst_5 = arith.constant dense<0.000000e+00> : vector<16xf32>
    %13 = vector.multi_reduction <add>, %12, %cst_5 [1] : vector<16x128xf32> to vector<16xf32>
    %14 = vector.shape_cast %13 : vector<16xf32> to vector<16x1xf32>
    %15 = math.sqrt %14 : vector<16x1xf32>
    %cst_6 = arith.constant 1.000000e+00 : f32
    %16 = vector.broadcast %cst_6 : f32 to vector<16x1xf32>
    %17 = arith.subf %16, %15 : vector<16x1xf32>
    %cst_7 = arith.constant 0.000000e+00 : f32
    %18 = vector.broadcast %cst_7 : f32 to vector<16x1xf32>
    %19 = arith.maximumf %17, %18 : vector<16x1xf32>
    %20 = arith.addi %3, %6 : i32
    %21 = tpu.iota {dimensions = array<i32: 0>} : vector<16x1xi32>
    %22 = vector.broadcast %20 : i32 to vector<16x1xi32>
    %23 = arith.addi %22, %21 : vector<16x1xi32>
    %c16_i32_8 = arith.constant 16 : i32
    %24 = vector.broadcast %c16_i32_8 : i32 to vector<16x1xi32>
    %25 = arith.cmpi slt, %23, %24 : vector<16x1xi32>
    %cst_9 = arith.constant 0.000000e+00 : f32
    %26 = vector.broadcast %cst_9 : f32 to vector<16x1xf32>
    %27 = arith.select %25, %19, %26 : vector<16x1xi1>, vector<16x1xf32>
    %28 = vector.shape_cast %27 : vector<16x1xf32> to vector<1x16x1xf32>
    %cst_10 = arith.constant dense<0.000000e+00> : vector<1xf32>
    %29 = vector.multi_reduction <add>, %28, %cst_10 [1, 2] : vector<1x16x1xf32> to vector<1xf32>
    %30 = vector.shape_cast %29 : vector<1xf32> to vector<1x1x1xf32>
    %31 = vector.extract %30[0, 0, 0] : f32 from vector<1x1x1xf32>
    %32 = arith.addf %cst, %31 : f32
    %c1_i32 = arith.constant 1 : i32
    %33 = arith.addf %4, %32 : f32
    %c0_11 = arith.constant 0 : index
    %34 = memref.load %arg4[%c0_11] : memref<1xf32, #tpu.memory_space<smem>>
    memref.store %33, %arg4[%c0_11] : memref<1xf32, #tpu.memory_space<smem>>
    %c0_i32_12 = arith.constant 0 : i32
    %35 = arith.cmpi eq, %arg0, %c0_i32_12 : i32
    %36 = arith.extui %35 : i1 to i32
    %c0_i32_13 = arith.constant 0 : i32
    %37 = arith.cmpi ne, %36, %c0_i32_13 : i32
    scf.if %37 {
      %c0_14 = arith.constant 0 : index
      %38 = memref.load %arg4[%c0_14] : memref<1xf32, #tpu.memory_space<smem>>
      %cst_15 = arith.constant 1.600000e+01 : f32
      %39 = arith.divf %38, %cst_15 : f32
      %c0_16 = arith.constant 0 : index
      %40 = memref.load %arg3[%c0_16] : memref<1xf32, #tpu.memory_space<smem>>
      memref.store %39, %arg3[%c0_16] : memref<1xf32, #tpu.memory_space<smem>>
    } else {
    }
    return
  }
  func.func @transform_0(%arg0: i32) -> (i32, i32) {
    %c0_i32 = arith.constant 0 : i32
    %c0_i32_0 = arith.constant 0 : i32
    return %arg0, %c0_i32 : i32, i32
  }
  func.func @transform_1(%arg0: i32) -> (i32, i32) {
    %c0_i32 = arith.constant 0 : i32
    %c0_i32_0 = arith.constant 0 : i32
    return %arg0, %c0_i32 : i32, i32
  }
  func.func @transform_2(%arg0: i32) -> i32 {
    %c0_i32 = arith.constant 0 : i32
    %c0_i32_0 = arith.constant 0 : i32
    return %c0_i32 : i32
  }
}

</mosaic_0001>

<bundles_post_ra>
// kernel: mytryoshka_loss.1
= control target key start
LH: loop header
LB: loop body
LE: loop exit
PB: predicated region body
PF: predicated region fallthrough
CT: control target
= control target key end

     0   :  { %7 = vsyncpa [#allocation4], 0  ;;  %s257_s0 = inlined_call_operand.hbm [shape: f32[16,128], index: 0, kind: input, shape index: {}]   ;;  %s258_s1 = inlined_call_operand.hbm [shape: f32[16,128], index: 1, kind: input, shape index: {}]   ;;  %s259_s2 = inlined_call_operand.hbm [shape: f32[1], index: 2, kind: output, shape index: {}]  }
   0x1   :  { %8 = vsyncpa [#allocation7], 0 }
   0x2   :  { %9 = vsyncpa [#allocation5], 0  ;;  %s201_s9 = smov [#allocation3]   ;;  %s141_s13 = scalar_lea.hbm %s257_s0, 256 }
   0x3   :  { %s15_s10 = sshll.u32 %s201_s9, 4  ;;  %p142_p0 = scmp.ne.s32.totalorder %s257_s0, %s141_s13  ;;  %s16_s10 = int_to_ptr.vmem [resolvable:$true] %s15_s10 }
   0x4   :  { %p145_p1 = scmp.lt.u32.totalorder %s141_s13, %s257_s0 }
   0x6   :  { %p147_p2 = pnand %p145_p1, %p142_p0 }
   0x8   :  { %150 = shalt.err (!%p147_p2)
}
   0x9   :  { %s151_s18 = scalar_lea.vmem %s16_s10, 256  ;;  %p156_p4 = scmp.lt.s32.totalorder %s16_s10, %s16_s10 }
   0xa   :  { %p152_p3 = scmp.ne.s32.totalorder %s16_s10, %s151_s18  ;;  %p157_p5 = scmp.lt.s32.totalorder %s151_s18, %s151_s18 }
   0xc   :  { %p158_p6 = por %p157_p5, %p156_p4 }
   0xe   :  { %p159_p7 = pnand %p158_p6, %p152_p3 }
  0x10   :  { %162 = shalt.err (!%p159_p7)
}
  0x11   :  { %s202_s19 = smov 128   ;;  %s203_s20 = smov 8  }
  0x12   :  { %21 = dma.hbm_to_vmem [thread:$0]  %s257_s0, 256, %s16_s10, [#allocation4], %s202_s19, %s202_s19, %s203_s20  }
  0x13   :  { %s204_s23 = smov [#allocation6]   ;;  %s163_s27 = scalar_lea.hbm %s258_s1, 256 }
  0x14   :  { %s27_s24 = sshll.u32 %s204_s23, 4  ;;  %p164_p8 = scmp.ne.s32.totalorder %s258_s1, %s163_s27  ;;  %s28_s24 = int_to_ptr.vmem [resolvable:$true] %s27_s24 }
  0x15   :  { %p167_p9 = scmp.lt.u32.totalorder %s163_s27, %s258_s1 }
  0x17   :  { %p169_p10 = pnand %p167_p9, %p164_p8 }
  0x19   :  { %172 = shalt.err (!%p169_p10)
}
  0x1a   :  { %s173_s4 = scalar_lea.vmem %s28_s24, 256  ;;  %p178_p12 = scmp.lt.s32.totalorder %s28_s24, %s28_s24 }
  0x1b   :  { %p174_p11 = scmp.ne.s32.totalorder %s28_s24, %s173_s4  ;;  %p179_p13 = scmp.lt.s32.totalorder %s173_s4, %s173_s4 }
  0x1d   :  { %p180_p0 = por %p179_p13, %p178_p12 }
  0x1f   :  { %p181_p1 = pnand %p180_p0, %p174_p11 }
  0x21   :  { %184 = shalt.err (!%p181_p1)
}
  0x22   :  { %33 = dma.hbm_to_vmem [thread:$0]  %s258_s1, 256, %s28_s24, [#allocation7], %s202_s19, %s202_s19, %s203_s20  }
  0x23   :  { %195 = dma.done.wait [#allocation4], 256  }
  0x24   :  { %196 = vsyncadd [#allocation4], 4294967040 }
  0x25   :  { %197 = dma.done.wait [#allocation7], 256  }
  0x26   :  { %198 = vsyncadd [#allocation7], 4294967040  ;;  %v48_v0 = vld [vmem:[#allocation3] sm:$0xff]  ;;  %v50_v1 = vld [vmem:[#allocation6] sm:$0xff]  ;;  %vm89_vm4 = vcmask 7168   ;;  %s185_s9 = scalar_lea.hbm %s259_s2, 16 }
  0x27   :  { %v49_v2 = vld [vmem:[#allocation3 + $0x8] sm:$0xff]  ;;  %v52_v3 = vsub.f32 %v48_v0, %v50_v1  ;;  %v51_v4 = vld [vmem:[#allocation6 + $0x8] sm:$0xff]  ;;  %p186_p2 = scmp.ne.s32.totalorder %s259_s2, %s185_s9  ;;  %p189_p3 = scmp.lt.u32.totalorder %s185_s9, %s259_s2 }
  0x28   :  { %v53_v5 = vsub.f32 %v49_v2, %v51_v4 }
  0x29   :  { %v54_v6 = vmul.f32 %v52_v3, %v52_v3  ;;  %p191_p4 = pnand %p189_p3, %p186_p2 }
  0x2a   :  { %v55_v7 = vmul.f32 %v53_v5, %v53_v5 }
  0x2b   :  { %56 = vadd.xlane.f32.xlu0 %v54_v6 }
  0x2f   :  { %58 = vadd.xlane.f32.xlu0 %v55_v7 }
  0xb8   :  { %v57_v8 = vpop.xlane.xlu0 %56 }
  0xb9   :  { %137 = vrsqrt.f32 %v57_v8  ;;  %vm62_vm0 = vcmp.eq.f32.partialorder %v57_v8, inf  ;;  %v65_v12 = vand.u32 2147483648, %v57_v8  ;;  %vm64_vm1 = vcmp.eq.f32.partialorder %v57_v8, 0.0 }
  0xbc   :  { %v59_v9 = vpop.xlane.xlu0 %58 }
  0xbd   :  { %139 = vrsqrt.f32 %v59_v9  ;;  %vm69_vm2 = vcmp.eq.f32.partialorder %v59_v9, inf  ;;  %v72_v18 = vand.u32 2147483648, %v59_v9  ;;  %vm71_vm3 = vcmp.eq.f32.partialorder %v59_v9, 0.0 }
  0xc3   :  { %v138_v10 = vpop.eup %137 }
  0xc4   :  { %v61_v11 = vmul.f32 %v138_v10, %v57_v8 }
  0xc6   :  { %v63_v13 = vsel %vm62_vm0, %v57_v8, %v61_v11 }
  0xc7   :  { %v140_v14 = vpop.eup %139  ;;  %v66_v15 = vsel %vm64_vm1, %v65_v12, %v63_v13 }
  0xc8   :  { %v68_v16 = vmul.f32 %v140_v14, %v59_v9  ;;  %v74_v17 = vsub.f32 1.0, %v66_v15 }
  0xca   :  { %v70_v19 = vsel %vm69_vm2, %v59_v9, %v68_v16  ;;  %v76_v22 = vmax.f32 %v74_v17, 0.0 }
  0xcb   :  { %v73_v20 = vsel %vm71_vm3, %v72_v18, %v70_v19 }
  0xcc   :  { %v75_v21 = vsub.f32 1.0, %v73_v20  ;;  %v90_v24 = vsel %vm89_vm4, %v76_v22, 0.0 }
  0xce   :  { %v77_v23 = vmax.f32 %v75_v21, 0.0 }
  0xd0   :  { %v91_v25 = vsel %vm89_vm4, %v77_v23, 0.0 }
  0xd1   :  { %v92_v26 = vadd.f32 %v91_v25, %v90_v24 }
  0xd3   :  { %93 = vadd.xlane.f32.xlu1 %v92_v26 }
 0x160   :  { %v94_v27 = vpop.xlane.xlu1 %93 }
 0x161   :  { %v95_v28 = vrot.slane %v94_v27, 4 }
 0x163   :  { %v96_v29 = vadd.f32 %v95_v28, %v94_v27 }
 0x165   :  { %v97_v30 = vrot.slane %v96_v29, 2 }
 0x167   :  { %v98_v31 = vadd.f32 %v97_v30, %v96_v29 }
 0x169   :  { %v99_v32 = vrot.slane %v98_v31, 1 }
 0x16b   :  { %v100_v33 = vadd.f32 %v99_v32, %v98_v31 }
 0x16d   :  { %130 = vpush %v100_v33 }
 0x19e   :  { %s131_s1 = spop %130 }
 0x19f   :  { %s112_s6 = smul.f32 0.0625, %s131_s1 }
 0x1a1   :  { %114 = sst [smem:[#allocation8]] %s112_s6 }
 0x1a2   :  { %194 = shalt.err (!%p191_p4)
}
 0x1a3   :  { %s205_s14 = smov [#allocation8]  }
 0x1a4   :  { %122 = dma.smem_to_hbm %s205_s14, 16, %s259_s2, [#allocation5]  }
 0x1a5   :  { %199 = dma.done.wait [#allocation5], 16  }
 0x1a6   :  { %200 = vsyncadd [#allocation5], 4294967280 }
 0x1a7   :  { %126 = sfence }
 0x1a8   :  { %127 = vsyncpa [#allocation4], 1 }
 0x1a9   :  { %128 = vsyncpa [#allocation7], 1 }
 0x1aa   :  { %129 = vsyncpa [#allocation5], 1 }

</bundles_post_ra>
